<compile_context>
chip_gen: v7x
topology: tpu7x:2x2x1
jax: 0.10.0
libtpu: 0.0.40
codegen_flags: <defaults>
</compile_context>

<pallas_src>
import jax
import jax.numpy as jnp
from jax.experimental import pallas as pl
from jax.experimental.pallas import tpu as pltpu


def _round_up(n, m):
    return (n + m - 1) // m * m


def _block_spec(shape, index_map, *, single_buffered=False):
    """BlockSpec helper; requests single-buffering when supported."""
    if single_buffered:
        try:
            return pl.BlockSpec(shape, index_map, pipeline_mode=pl.Buffered(1))
        except Exception:
            pass  # older jax: fall back to default double buffering
    return pl.BlockSpec(shape, index_map)


def _softmax_linear_kernel(x_ref, w_ref, b_ref, logits_ref, probs_ref):
    # logits = x @ W^T + b ; W is pre-transposed + zero-padded to (In, O_pad)
    # and the padded class columns of b carry -1e30, so they vanish in the
    # softmax without any in-kernel masking.
    logits = jnp.dot(x_ref[...], w_ref[...],
                     preferred_element_type=jnp.float32) + b_ref[...]
    logits_ref[...] = logits.astype(logits_ref.dtype)

    # Numerically stable row-wise softmax (dim=1), all f32 elementwise math.
    m = jnp.max(logits, axis=-1, keepdims=True)
    e = jnp.exp(logits - m)
    denom = jnp.sum(e, axis=-1, keepdims=True)
    probs_ref[...] = (e * pl.reciprocal(denom, approx=True)).astype(probs_ref.dtype)


def softmax_layer_forward(x, weight, bias, *, block_b=512,
                          matmul_dtype=jnp.bfloat16,
                          logits_store_dtype=jnp.bfloat16):
    """Pallas equivalent of SoftmaxLayer.forward -> (logits, softmax(logits)).

    x: (B, In); weight: (Out, In) PyTorch-style; bias: (Out,).
    Returns f32 (B, Out) logits and probs.
    """
    B, In = x.shape
    O, In_w = weight.shape
    assert In == In_w
    O_pad = _round_up(max(O, 128), 128)

    # ---- one-time layout plumbing in the wrapper (outside the kernel) ----
    # weight: (Out, In) -> (In, O_pad) bf16, class axis zero-padded (lane-dense)
    w_t = jnp.zeros((In, O_pad), matmul_dtype).at[:, :O].set(
        weight.T.astype(matmul_dtype))
    # bias stays f32 (added after the f32 MXU accumulation); padded class
    # columns get a large negative value so exp() underflows to 0.
    b_p = jnp.full((1, O_pad), -1e30, jnp.float32).at[:, :O].set(
        bias.reshape(1, O).astype(jnp.float32))
    x_in = x.astype(matmul_dtype)

    # ---- batch-tile selection under a generation-aware VMEM budget ----
    itm = jnp.dtype(matmul_dtype).itemsize
    itl = jnp.dtype(logits_store_dtype).itemsize
    resident = In * O_pad * itm + O_pad * 4            # single-buffered W + bias

    def tile_bytes(tb):                                # double-buffered tiles
        return 2 * (tb * In * itm + tb * O_pad * itl + tb * O_pad * 4)

    try:
        vmem_cap = int(pltpu.get_tpu_info().vmem_capacity_bytes)
    except Exception:
        vmem_cap = 64 * 1024 * 1024                    # v7x per-TC (smallest)
    vmem_limit = int(min((vmem_cap * 3) // 4, 96 * 1024 * 1024))
    budget = vmem_limit - 2 * 1024 * 1024              # compiler-scratch headroom

    if B <= 16:
        TB = B                                         # one tile, block == array dims
    else:
        TB = min(_round_up(block_b, 16), _round_up(B, 16))
        # keep >= 2 grid steps so ("parallel",) can use both v7x TensorCores
        TB = min(TB, _round_up(pl.cdiv(B, 2), 16))
        while TB > 16 and resident + tile_bytes(TB) > budget:
            TB = _round_up(TB // 2, 16)
    # TODO(synk): if `resident` (In*O_pad weight) alone exceeds the VMEM budget
    # (very large out_features), tile the class axis with an online-softmax
    # accumulator instead of keeping the whole weight VMEM-resident.

    grid = (pl.cdiv(B, TB),)

    logits_p, probs_p = pl.pallas_call(
        _softmax_linear_kernel,
        out_shape=(
            jax.ShapeDtypeStruct((B, O_pad), logits_store_dtype),
            jax.ShapeDtypeStruct((B, O_pad), jnp.float32),
        ),
        grid_spec=pltpu.PrefetchScalarGridSpec(
            num_scalar_prefetch=0,
            grid=grid,
            in_specs=[
                _block_spec((TB, In), lambda i: (i, 0)),                       # x tile
                _block_spec((In, O_pad), lambda i: (0, 0), single_buffered=True),  # W
                _block_spec((1, O_pad), lambda i: (0, 0), single_buffered=True),   # b
            ],
            out_specs=(
                pl.BlockSpec((TB, O_pad), lambda i: (i, 0)),                   # logits
                pl.BlockSpec((TB, O_pad), lambda i: (i, 0)),                   # probs
            ),
        ),
        compiler_params=pltpu.CompilerParams(
            dimension_semantics=("parallel",),
            vmem_limit_bytes=vmem_limit,
        ),
    )(x_in, w_t, b_p)

    # Slice away class padding; return f32 logits to match the module's dtype.
    logits = logits_p[:, :O].astype(jnp.float32)
    probs = probs_p[:, :O]
    return logits, probs


def init_params(key, in_features, out_features):
    """Deterministic init mirroring the PyTorch module:
    xavier_uniform_ on weight, default nn.Linear uniform on bias."""
    kw, kb = jax.random.split(key)
    a = (6.0 / (in_features + out_features)) ** 0.5
    weight = jax.random.uniform(
        kw, (out_features, in_features), jnp.float32, minval=-a, maxval=a
    )
    bound = 1.0 / (in_features ** 0.5)
    bias = jax.random.uniform(
        kb, (out_features,), jnp.float32, minval=-bound, maxval=bound
    )
    return weight, bias


# TODO(synk): Adam optimizer / CrossEntropyLoss / train() are training state,
# not part of the forward pass, and are intentionally not implemented here.

if __name__ == "__main__":
    key = jax.random.PRNGKey(0)
    kx, kp = jax.random.split(key)

    batch = 8
    in_features = 32
    out_features = 8

    x = jax.random.normal(kx, (batch, in_features), jnp.float32)
    weight, bias = init_params(kp, in_features, out_features)

    logits, probs = softmax_layer_forward(x, weight, bias)
    jax.block_until_ready((logits, probs))

    # sanity check vs plain-JAX f32 reference (tolerances relaxed for the
    # bf16 MXU operands, the bf16 logits writeback and the EUP approximate
    # reciprocal in the softmax denominator)
    ref_logits = x @ weight.T + bias
    ref_probs = jax.nn.softmax(ref_logits, axis=1)
    assert logits.shape == (batch, out_features)
    assert probs.shape == (batch, out_features)
    assert jnp.allclose(logits, ref_logits, atol=3e-2, rtol=3e-2)
    assert jnp.allclose(probs, ref_probs, atol=2e-2, rtol=2e-2)
    assert jnp.allclose(jnp.sum(probs, axis=1), 1.0, atol=5e-3)

    print("KERNEL_OK")
</pallas_src>

<mosaic_0001>
module attributes {stable_mosaic.version = 11 : i64} {
  func.func @_softmax_linear_kernel(%arg0: i32, %arg1: memref<8x32xbf16, #tpu.memory_space<vmem>>, %arg2: memref<32x128xbf16, #tpu.memory_space<vmem>>, %arg3: memref<1x128xf32, #tpu.memory_space<vmem>>, %arg4: memref<8x128xbf16, #tpu.memory_space<vmem>>, %arg5: memref<8x128xf32, #tpu.memory_space<vmem>>) attributes {dimension_semantics = [#tpu.dimension_semantics<parallel>], iteration_bounds = array<i64: 1>, scalar_prefetch = 0 : i64, scratch_operands = 0 : i64, tpu.core_type = #tpu.core_type<tc>, window_params = [{transform_indices = @transform_0, window_bounds = array<i64: 8, 32>}, {pipeline_mode = #tpu.pipeline_mode<synchronous>, transform_indices = @transform_1, window_bounds = array<i64: 32, 128>}, {pipeline_mode = #tpu.pipeline_mode<synchronous>, transform_indices = @transform_2, window_bounds = array<i64: 1, 128>}, {transform_indices = @transform_3, window_bounds = array<i64: 8, 128>}, {transform_indices = @transform_4, window_bounds = array<i64: 8, 128>}]} {
    %c0 = arith.constant 0 : index
    %c0_0 = arith.constant 0 : index
    %0 = vector.load %arg1[%c0, %c0_0] : memref<8x32xbf16, #tpu.memory_space<vmem>>, vector<8x32xbf16>
    %c0_1 = arith.constant 0 : index
    %c0_2 = arith.constant 0 : index
    %1 = vector.load %arg2[%c0_1, %c0_2] : memref<32x128xbf16, #tpu.memory_space<vmem>>, vector<32x128xbf16>
    %cst = arith.constant dense<0.000000e+00> : vector<8x128xf32>
    %2 = tpu.matmul %0, %1, %cst {dimension_numbers = #tpu.dot_dimension_numbers<[1], [0], [0], [1], [0, 0, 1, 1], [], []>} : vector<8x32xbf16>, vector<32x128xbf16>, vector<8x128xf32> -> vector<8x128xf32>
    %c0_3 = arith.constant 0 : index
    %c0_4 = arith.constant 0 : index
    %3 = vector.load %arg3[%c0_3, %c0_4] : memref<1x128xf32, #tpu.memory_space<vmem>>, vector<1x128xf32>
    %4 = vector.broadcast %3 : vector<1x128xf32> to vector<8x128xf32>
    %5 = arith.addf %2, %4 : vector<8x128xf32>
    %6 = arith.truncf %5 : vector<8x128xf32> to vector<8x128xbf16>
    %c0_5 = arith.constant 0 : index
    %c0_6 = arith.constant 0 : index
    %7 = vector.load %arg4[%c0_5, %c0_6] : memref<8x128xbf16, #tpu.memory_space<vmem>>, vector<8x128xbf16>
    tpu.vector_store %arg4[%c0_5, %c0_6], %6 {strides = array<i32>} : memref<8x128xbf16, #tpu.memory_space<vmem>>, vector<8x128xbf16>,
    %cst_7 = arith.constant dense<0xFF800000> : vector<8xf32>
    %8 = vector.multi_reduction <maximumf>, %5, %cst_7 [1] : vector<8x128xf32> to vector<8xf32>
    %9 = vector.shape_cast %8 : vector<8xf32> to vector<8x1xf32>
    %10 = vector.broadcast %9 : vector<8x1xf32> to vector<8x128xf32>
    %11 = arith.subf %5, %10 : vector<8x128xf32>
    %12 = math.exp %11 : vector<8x128xf32>
    %cst_8 = arith.constant dense<0.000000e+00> : vector<8xf32>
    %13 = vector.multi_reduction <add>, %12, %cst_8 [1] : vector<8x128xf32> to vector<8xf32>
    %14 = vector.shape_cast %13 : vector<8xf32> to vector<8x1xf32>
    %15 = tpu.reciprocal %14 {approx = true} : vector<8x1xf32> -> vector<8x1xf32>
    %16 = vector.broadcast %15 : vector<8x1xf32> to vector<8x128xf32>
    %17 = arith.mulf %12, %16 : vector<8x128xf32>
    %c0_9 = arith.constant 0 : index
    %c0_10 = arith.constant 0 : index
    %18 = vector.load %arg5[%c0_9, %c0_10] : memref<8x128xf32, #tpu.memory_space<vmem>>, vector<8x128xf32>
    tpu.vector_store %arg5[%c0_9, %c0_10], %17 {strides = array<i32>} : memref<8x128xf32, #tpu.memory_space<vmem>>, vector<8x128xf32>,
    return
  }
  func.func @transform_0(%arg0: i32) -> (i32, i32) {
    %c0_i32 = arith.constant 0 : i32
    %c0_i32_0 = arith.constant 0 : i32
    return %arg0, %c0_i32 : i32, i32
  }
  func.func @transform_1(%arg0: i32) -> (i32, i32) {
    %c0_i32 = arith.constant 0 : i32
    %c0_i32_0 = arith.constant 0 : i32
    %c0_i32_1 = arith.constant 0 : i32
    return %c0_i32, %c0_i32_0 : i32, i32
  }
  func.func @transform_2(%arg0: i32) -> (i32, i32) {
    %c0_i32 = arith.constant 0 : i32
    %c0_i32_0 = arith.constant 0 : i32
    %c0_i32_1 = arith.constant 0 : i32
    return %c0_i32, %c0_i32_0 : i32, i32
  }
  func.func @transform_3(%arg0: i32) -> (i32, i32) {
    %c0_i32 = arith.constant 0 : i32
    %c0_i32_0 = arith.constant 0 : i32
    return %arg0, %c0_i32 : i32, i32
  }
  func.func @transform_4(%arg0: i32) -> (i32, i32) {
    %c0_i32 = arith.constant 0 : i32
    %c0_i32_0 = arith.constant 0 : i32
    return %arg0, %c0_i32 : i32, i32
  }
}

</mosaic_0001>

<bundles_post_ra>
// kernel: tpu_custom_call.1
= control target key start
LH: loop header
LB: loop body
LE: loop exit
PB: predicated region body
PF: predicated region fallthrough
CT: control target
= control target key end

     0   :  { %10 = vsyncpa [#allocation3], 0  ;;  %s371_s0 = inlined_call_operand.hbm [shape: bf16[8,32], index: 0, kind: input, shape index: {}]   ;;  %s372_s1 = inlined_call_operand.hbm [shape: bf16[32,128], index: 1, kind: input, shape index: {}]   ;;  %s373_s2 = inlined_call_operand.vmem [shape: f32[1,128], index: 2, kind: input, shape index: {}]   ;;  %s374_s3 = inlined_call_operand.hbm [shape: bf16[8,128], index: 3, kind: output, shape index: {0}]   ;;  %s375_s4 = inlined_call_operand.hbm [shape: f32[8,128], index: 4, kind: output, shape index: {1}]  }
   0x1   :  { %11 = vsyncpa [#allocation6], 0 }
   0x2   :  { %12 = vsyncpa [#allocation4], 0 }
   0x3   :  { %13 = vsyncpa [#allocation9], 0  ;;  %s280_s15 = smov [#allocation2]   ;;  %s281_s17 = smov [#allocation5]  }
   0x4   :  { %s20_s16 = sshll.u32 %s280_s15, 4  ;;  %s29_s18 = sshll.u32 %s281_s17, 4  ;;  %s21_s16 = int_to_ptr.vmem [resolvable:$true] %s20_s16  ;;  %s313_s18 = int_to_ptr.vmem [resolvable:$true] %s29_s18 }
   0x5   :  { %s184_s21 = scalar_lea.hbm %s371_s0, 64 }
   0x6   :  { %p185_p0 = scmp.ne.s32.totalorder %s371_s0, %s184_s21  ;;  %p188_p1 = scmp.lt.u32.totalorder %s184_s21, %s371_s0 }
   0x8   :  { %p190_p2 = pnand %p188_p1, %p185_p0 }
   0xa   :  { %193 = shalt.err (!%p190_p2)
}
   0xb   :  { %s194_s26 = scalar_lea.vmem %s21_s16, 64  ;;  %p199_p4 = scmp.lt.s32.totalorder %s21_s16, %s21_s16 }
   0xc   :  { %p195_p3 = scmp.ne.s32.totalorder %s21_s16, %s194_s26  ;;  %p200_p5 = scmp.lt.s32.totalorder %s194_s26, %s194_s26 }
   0xe   :  { %p201_p6 = por %p200_p5, %p199_p4 }
  0x10   :  { %p202_p7 = pnand %p201_p6, %p195_p3 }
  0x12   :  { %205 = shalt.err (!%p202_p7)
}
  0x13   :  { %23 = dma.hbm_to_vmem [thread:$0]  %s371_s0, 64, %s21_s16, [#allocation3]  }
  0x14   :  { %s206_s5 = scalar_lea.hbm %s372_s1, 256 }
  0x15   :  { %p207_p8 = scmp.ne.s32.totalorder %s372_s1, %s206_s5  ;;  %p210_p9 = scmp.lt.u32.totalorder %s206_s5, %s372_s1 }
  0x17   :  { %p212_p10 = pnand %p210_p9, %p207_p8 }
  0x19   :  { %215 = shalt.err (!%p212_p10)
}
  0x1a   :  { %s216_s10 = scalar_lea.vmem %s313_s18, 256  ;;  %p221_p12 = scmp.lt.s32.totalorder %s313_s18, %s313_s18 }
  0x1b   :  { %p217_p11 = scmp.ne.s32.totalorder %s313_s18, %s216_s10  ;;  %p222_p13 = scmp.lt.s32.totalorder %s216_s10, %s216_s10 }
  0x1d   :  { %p223_p0 = por %p222_p13, %p221_p12 }
  0x1f   :  { %p224_p1 = pnand %p223_p0, %p217_p11 }
  0x21   :  { %227 = shalt.err (!%p224_p1)
}
  0x22   :  { %s282_s0 = smov 64   ;;  %s283_s11 = smov 4  }
  0x23   :  { %35 = dma.hbm_to_vmem [thread:$0]  %s372_s1, 256, %s313_s18, [#allocation6], %s282_s0, %s282_s0, %s283_s11  }
  0x24   :  { %272 = dma.done.wait [#allocation3], 64  }
  0x25   :  { %273 = vsyncadd [#allocation3], 4294967232 }
  0x26   :  { %274 = dma.done.wait [#allocation6], 256  }
  0x27   :  { %275 = vsyncadd [#allocation6], 4294967040  ;;  %v284_v0 = vmov 0.0   ;;  %vm285_vm0 = vmmov 0   ;;  %v178_v1 = vld [vmem:[#allocation5] sm:$0xff]   ;;  %v179_v2 = vld [vmem:[#allocation5 + $0x8] sm:$0xff]  }
  0x28   :  { %162 = vmatprep.subr.bf16.mxu0 %v284_v0  ;;  %166 = vmatprep.mubr.msk.bf16.mxu0 %vm285_vm0, %v284_v0  ;;  %v45_v3 = vld [vmem:[#allocation2] sm:$0xf]  ;;  %vm69_vm1 = vcmask 261120   ;;  %s286_s1 = smov [#allocation7]  }
  0x29   :  { %163 = vmatpush3.bf16.msra.mxu0 %v178_v1  ;;  %v155_v4 = vld [vmem:[%s373_s2] ss:$0 sm:$0xff]  ;;  %s131_s16 = sshll.u32 %s286_s1, 4  ;;  %s132_s16 = int_to_ptr.vmem [resolvable:$true] %s131_s16 }
  0x2a   :  { %164 = vmatprep.subr.bf16.mxu0 %v284_v0  ;;  %s228_s17 = scalar_lea.vmem %s132_s16, 64  ;;  %p233_p3 = scmp.lt.s32.totalorder %s132_s16, %s132_s16 }
  0x2b   :  { %p229_p2 = scmp.ne.s32.totalorder %s132_s16, %s228_s17  ;;  %p234_p4 = scmp.lt.s32.totalorder %s228_s17, %s228_s17 }
  0x2d   :  { %165 = vmatpush3.bf16.msra.mxu0 %v179_v2  ;;  %p235_p5 = por %p234_p4, %p233_p3 }
  0x2f   :  { %p236_p6 = pnand %p235_p5, %p229_p2 }
  0x30   :  { %167 = vmatmul.mubr.msk.bf16.vlgmr.msra.gmra.mrb[0].mxu0 %vm69_vm1, %v45_v3 }
 0x103   :  { %v107_v5 = vpop.f32.mrb[0].mxu0 }
 0x104   :  { %v108_v6 = vadd.f32 %v155_v4, %v107_v5  ;;  %v168_v7 = vpop.f32.mrb[1].mxu0 }
 0x105   :  { %v110_v8 = vpop.f32.mrb[2].mxu0 }
 0x106   :  { %115 = vmax.xlane.f32.xlu0 %v108_v6  ;;  %v169_v9 = vpop.f32.mrb[3].mxu0  ;;  %v113_v10 = vpack.c.bf16 %v108_v6, %v108_v6 }
 0x108   :  { %114 = vst [vmem:[#allocation7] sm:$0xf] %v113_v10 }
 0x193   :  { %v116_v11 = vpop.xlane.xlu0 %115 }
 0x194   :  { %v117_v12 = vsub.f32 %v108_v6, %v116_v11 }
 0x196   :  { %v118_v13 = vmul.f32 1.442695, %v117_v12 }
 0x198   :  { %180 = vpow2.f32 %v118_v13 }
 0x1a2   :  { %v181_v14 = vpop.eup %180 }
 0x1a3   :  { %120 = vadd.xlane.f32.xlu0 %v181_v14 }
 0x1a4   :  { %239 = shalt.err (!%p236_p6)
}
 0x1a5   :  { %s240_s19 = scalar_lea.hbm %s374_s3, 64 }
 0x1a6   :  { %p241_p7 = scmp.ne.s32.totalorder %s374_s3, %s240_s19  ;;  %p244_p8 = scmp.lt.u32.totalorder %s240_s19, %s374_s3 }
 0x1a8   :  { %p246_p9 = pnand %p244_p8, %p241_p7 }
 0x1aa   :  { %249 = shalt.err (!%p246_p9)
}
 0x1ab   :  { %134 = dma.vmem_to_hbm [thread:$0]  %s132_s16, 64, %s374_s3, [#allocation4]  }
 0x1ac   :  { %s287_s26 = smov [#allocation8]  }
 0x1ad   :  { %s141_s27 = sshll.u32 %s287_s26, 4  ;;  %s142_s27 = int_to_ptr.vmem [resolvable:$true] %s141_s27 }
 0x1ae   :  { %s250_s28 = scalar_lea.vmem %s142_s27, 128  ;;  %p255_p11 = scmp.lt.s32.totalorder %s142_s27, %s142_s27 }
 0x1af   :  { %p251_p10 = scmp.ne.s32.totalorder %s142_s27, %s250_s28  ;;  %p256_p12 = scmp.lt.s32.totalorder %s250_s28, %s250_s28 }
 0x1b1   :  { %p257_p13 = por %p256_p12, %p255_p11 }
 0x1b3   :  { %p258_p0 = pnand %p257_p13, %p251_p10 }
 0x230   :  { %v121_v15 = vpop.xlane.xlu0 %120 }
 0x231   :  { %182 = vrcp.f32 %v121_v15 }
 0x23b   :  { %v183_v16 = vpop.eup %182 }
 0x23c   :  { %v123_v17 = vmul.f32 %v183_v16, %v181_v14 }
 0x23e   :  { %124 = vst [vmem:[#allocation8] sm:$0xff] %v123_v17 }
 0x23f   :  { %261 = shalt.err (!%p258_p0)
}
 0x240   :  { %s262_s5 = scalar_lea.hbm %s375_s4, 128 }
 0x241   :  { %p263_p1 = scmp.ne.s32.totalorder %s375_s4, %s262_s5  ;;  %p266_p2 = scmp.lt.u32.totalorder %s262_s5, %s375_s4 }
 0x243   :  { %p268_p3 = pnand %p266_p2, %p263_p1 }
 0x245   :  { %271 = shalt.err (!%p268_p3)
}
 0x246   :  { %144 = dma.vmem_to_hbm [thread:$0]  %s142_s27, 128, %s375_s4, [#allocation9]  }
 0x247   :  { %276 = dma.done.wait [#allocation4], 64  }
 0x248   :  { %277 = vsyncadd [#allocation4], 4294967232 }
 0x249   :  { %278 = dma.done.wait [#allocation9], 128  }
 0x24a   :  { %279 = vsyncadd [#allocation9], 4294967168 }
 0x24b   :  { %151 = vsyncpa [#allocation3], 1 }
 0x24c   :  { %152 = vsyncpa [#allocation6], 1 }
 0x24d   :  { %153 = vsyncpa [#allocation4], 1 }
 0x24e   :  { %154 = vsyncpa [#allocation9], 1 }

</bundles_post_ra>
